<compile_context>
chip_gen: v5e
topology: v5e:2x2
jax: 0.10.0
libtpu: 0.0.40
codegen_flags: <defaults>
</compile_context>

<pallas_src>
import jax
import jax.numpy as jnp
from jax.experimental import pallas as pl
from jax.experimental.pallas import tpu as pltpu


def _pointwise_conv_kernel(w_ref, x_ref, o_ref):
    # w_ref: (C_out, C_in)   -- resident weight block
    # x_ref: (1, C_in, tL)   -- activation tile, NCL-native, L on the lane axis
    # o_ref: (1, C_out, tL)
    o_ref[0] = jnp.dot(
        w_ref[...], x_ref[0], preferred_element_type=jnp.float32
    ).astype(o_ref.dtype)


def masked_conv1d(x, weight, mask=None, *, max_tile_l=2048):
    """Equivalent of MaskedConv1D.forward (kernel_size=1, stride=1, bias=False).

    x:      (N, C_in, L)
    weight: (C_out, C_in) or (C_out, C_in, 1)  (Conv1d k=1 weight)
    mask:   passed through unchanged (spec's forward does not apply it)
    Returns (out, mask) with out: (N, C_out, L)
    """
    n, c_in, length = x.shape

    if weight.ndim == 3:
        assert weight.shape[2] == 1, "only kernel_size=1 is supported"
        weight = weight[:, :, 0]
    c_out, w_c_in = weight.shape
    assert w_c_in == c_in, "weight in_channels must match x"
    # TODO(synk): bias=True variant not implemented (module default is bias=False).

    # Lane-dense L tiling: either the full L (small case) or a multiple of 128
    # (Pallas masks the ragged edge block).  max_tile_l=2048 keeps the f32
    # working set well under v7x's 64 MiB VMEM even with double-buffering.
    if length <= max_tile_l:
        tile_l = length
    else:
        tile_l = max_tile_l  # multiple of 128
    grid = (n, pl.cdiv(length, tile_l))

    out = pl.pallas_call(
        _pointwise_conv_kernel,
        out_shape=jax.ShapeDtypeStruct((n, c_out, length), x.dtype),
        grid_spec=pltpu.PrefetchScalarGridSpec(
            num_scalar_prefetch=0,
            grid=grid,
            in_specs=[
                # Weight stays resident across the whole grid.
                pl.BlockSpec((c_out, c_in), lambda b, l: (0, 0)),
                # Activation tile: one batch row, full C_in, tile_l along L.
                pl.BlockSpec((1, c_in, tile_l), lambda b, l: (b, 0, l)),
            ],
            out_specs=pl.BlockSpec((1, c_out, tile_l), lambda b, l: (b, 0, l)),
        ),
        compiler_params=pltpu.CompilerParams(
            dimension_semantics=("parallel", "parallel"),
            vmem_limit_bytes=32 * 1024 * 1024,
        ),
    )(weight, x)

    return out, mask


if __name__ == "__main__":
    key = jax.random.PRNGKey(0)
    k_x, k_w, k_m = jax.random.split(key, 3)

    batch, in_channels, out_channels, length = 2, 4, 8, 16

    x = jax.random.normal(k_x, (batch, in_channels, length), dtype=jnp.float32)
    # Conv1d(in, out, kernel_size=1, bias=False) weight: (out, in, 1) squeezed.
    weight = jax.random.normal(
        k_w, (out_channels, in_channels), dtype=jnp.float32
    ) * (1.0 / jnp.sqrt(in_channels))
    mask = jax.random.bernoulli(k_m, 0.5, (batch, 1, length))

    out, out_mask = masked_conv1d(x, weight, mask)
    out = jax.block_until_ready(out)

    # Reference: Conv1d with kernel_size=1 == channel matmul in NCL layout.
    ref = jnp.einsum("oc,ncl->nol", weight, x)
    assert out.shape == (batch, out_channels, length)
    assert jnp.allclose(out, ref, atol=1e-5, rtol=1e-5)
    assert out_mask is mask  # mask passed through unchanged, per the spec

    print("KERNEL_OK")
</pallas_src>

<mosaic_0001>
module attributes {stable_mosaic.version = 11 : i64} {
  func.func @_pointwise_conv_kernel(%arg0: i32, %arg1: i32, %arg2: memref<8x4xf32, #tpu.memory_space<vmem>>, %arg3: memref<1x4x16xf32, #tpu.memory_space<vmem>>, %arg4: memref<1x8x16xf32, #tpu.memory_space<vmem>>) attributes {dimension_semantics = [#tpu.dimension_semantics<parallel>, #tpu.dimension_semantics<parallel>], iteration_bounds = array<i64: 2, 1>, scalar_prefetch = 0 : i64, scratch_operands = 0 : i64, tpu.core_type = #tpu.core_type<tc>, window_params = [{pipeline_mode = #tpu.pipeline_mode<synchronous>, transform_indices = @transform_0, window_bounds = array<i64: 8, 4>}, {transform_indices = @transform_1, window_bounds = array<i64: 1, 4, 16>}, {transform_indices = @transform_2, window_bounds = array<i64: 1, 8, 16>}]} {
    %c0 = arith.constant 0 : index
    %c0_0 = arith.constant 0 : index
    %0 = vector.load %arg2[%c0, %c0_0] : memref<8x4xf32, #tpu.memory_space<vmem>>, vector<8x4xf32>
    %c0_1 = arith.constant 0 : index
    %c0_2 = arith.constant 0 : index
    %c0_3 = arith.constant 0 : index
    %1 = vector.load %arg3[%c0_1, %c0_2, %c0_3] : memref<1x4x16xf32, #tpu.memory_space<vmem>>, vector<1x4x16xf32>
    %2 = vector.shape_cast %1 : vector<1x4x16xf32> to vector<4x16xf32>
    %cst = arith.constant dense<0.000000e+00> : vector<8x16xf32>
    %3 = tpu.matmul %0, %2, %cst {dimension_numbers = #tpu.dot_dimension_numbers<[1], [0], [0], [1], [0, 0, 1, 1], [], []>} : vector<8x4xf32>, vector<4x16xf32>, vector<8x16xf32> -> vector<8x16xf32>
    %c0_4 = arith.constant 0 : index
    %c0_5 = arith.constant 0 : index
    %c0_6 = arith.constant 0 : index
    %4 = vector.load %arg4[%c0_4, %c0_5, %c0_6] : memref<1x8x16xf32, #tpu.memory_space<vmem>>, vector<1x8x16xf32>
    %5 = vector.shape_cast %4 : vector<1x8x16xf32> to vector<8x16xf32>
    %6 = vector.shape_cast %3 : vector<8x16xf32> to vector<1x8x16xf32>
    tpu.vector_store %arg4[%c0_4, %c0_5, %c0_6], %6 {strides = array<i32>} : memref<1x8x16xf32, #tpu.memory_space<vmem>>, vector<1x8x16xf32>,
    return
  }
  func.func @transform_0(%arg0: i32, %arg1: i32) -> (i32, i32) {
    %c0_i32 = arith.constant 0 : i32
    %c0_i32_0 = arith.constant 0 : i32
    %c0_i32_1 = arith.constant 0 : i32
    return %c0_i32, %c0_i32_0 : i32, i32
  }
  func.func @transform_1(%arg0: i32, %arg1: i32) -> (i32, i32, i32) {
    %c0_i32 = arith.constant 0 : i32
    %c0_i32_0 = arith.constant 0 : i32
    return %arg0, %c0_i32, %arg1 : i32, i32, i32
  }
  func.func @transform_2(%arg0: i32, %arg1: i32) -> (i32, i32, i32) {
    %c0_i32 = arith.constant 0 : i32
    %c0_i32_0 = arith.constant 0 : i32
    return %arg0, %c0_i32, %arg1 : i32, i32, i32
  }
}

</mosaic_0001>

<bundles_post_ra>
// kernel: tpu_custom_call.1
= control target key start
LH: loop header
LB: loop body
LE: loop exit
PB: predicated region body
PF: predicated region fallthrough
CT: control target
= control target key end

     0   :  { %7 = vsyncpa [#allocation3], 0  ;;  %s547_s0 = inlined_call_operand.vmem [shape: f32[8,4], index: 0, kind: input, shape index: {}]   ;;  %s548_s1 = inlined_call_operand.vmem [shape: f32[2,4,16], index: 1, kind: input, shape index: {}]   ;;  %s549_s2 = inlined_call_operand.hbm [shape: f32[2,8,16], index: 2, kind: output, shape index: {}]  }
   0x1   :  { %9 = vsyncpa [#allocation3 + $0x1], 0  ;;  %s447_s9 = smov 0   ;;  %s449_s10 = smov 0  }
   0x2   :  { %s451_s11 = smov 0   ;;  %s453_s12 = smov 0  }
   0x3   :  { %s455_s13 = smov 0   ;;  %s457_s14 = smov 0  }
   0x4 LB: > { %s284_s15 = sadd.s32 4294967295, %s430_s14   ;;  %s285_s16 = sadd.s32 4294967294, %s430_s14   ;;  %s430_s14 = sphi %s457_s14, %s15_s14   ;;  %s426_s13 = sphi %s455_s13, %s556_s13   ;;  %s422_s12 = sphi %s453_s12, %s555_s12   ;;  %s418_s11 = sphi %s451_s11, %s554_s11   ;;  %s414_s10 = sphi %s449_s10, %s553_s10   ;;  %s410_s9 = sphi %s447_s9, %s552_s9  }
   0x5   : > { %s27_s17 = sadd.s32 1, %s426_s13  ;;  %s85_s18 = sadd.s32 1, %s418_s11 }
   0x6   : > { %p29_p0 = scmp.ge.s32.totalorder %s27_s17, 2  ;;  %p95_p1 = scmp.ne.s32.totalorder %s418_s11, %s414_s10 }
   0x7   : > { %p96_p2 = scmp.eq.s32.totalorder %s284_s15, 1  ;;  %p101_p3 = scmp.ne.s32.totalorder %s414_s10, %s410_s9 }
   0x8   : > { %s558_s17 = smov (%p29_p0, %s27_s17), 0  ;;  %p102_p5 = scmp.eq.s32.totalorder %s285_s16, 1 }
   0x9   : > { %p487_p4 = por %p96_p2, %p95_p1  ;;  %s80_s20 = ssub.s32 %s426_s13, %s558_s17 }
   0xa   : > { %p288_p6 = scmp.ge.s32.totalorder %s430_s14, 1  ;;  %p83_p7 = scmp.eq.s32.totalorder %s80_s20, 0 }
   0xb   : > { %p494_p8 = por %p102_p5, %p101_p3  ;;  %p133_p9 = scmp.lt.s32.totalorder %s430_s14, 3 }
   0xc   : > { %s500_s22 = scalar_select %p83_p7, %s418_s11, %s85_s18  }
   0xd   : > { %p134_p10 = pnand %p288_p6, %p133_p9 }
   0xe   : > { %p157_p11 = scmp.lt.s32.totalorder (!%p134_p10), %s422_s12, 1  ;;  %s154_s30 = sand.u32 (!%p134_p10), 1, %s414_s10  }
   0xf   : > { %137 = sbr.rel (%p134_p10) target bundleno = 155 (0x9b), region = 28  ;;  %s289_s3 = sshll.u32 (!%p134_p10), %s154_s30, 3 }
  0x10   : > { %s294_s4 = sshll.u32 (!%p134_p10), %s422_s12, 3  ;;  %s156_s8 = scalar_lea.vmem (!%p134_p10), [#allocation2], %s289_s3 }
  0x11   : > { %s208_s7 = scalar_lea.hbm (!%p134_p10), %s549_s2, %s294_s4  ;;  %s210_s15 = sshll.u32 (!%p134_p10), %s156_s8, 4  ;;  %s211_s15 = int_to_ptr.vmem [resolvable:$true] %s210_s15 }
  0x12   : > { %s212_s16 = sshll.u32 (!%p134_p10), %s208_s7, 4  ;;  %s197_s18 = scalar_lea.sflag (!%p134_p10), [#allocation3], %s154_s30  ;;  %s213_s16 = int_to_ptr.hbm [resolvable:$true] %s212_s16 }
  0x13   : > { %s366_s20 = sshra.s32 (!%p134_p10), %s213_s16, 4  ;;  %s372_s25 = scalar_lea.hbm (!%p134_p10), %s549_s2, 16  ;;  %s367_s20 = int_to_ptr.hbm [resolvable:$true] %s366_s20 }
  0x14   : > { %s158_s23 = scalar_select %p157_p11, %s422_s12, 1  ;;  %vm170_vm0 = vcmask 1043456   ;;  %v164_v0 = vld [vmem:[%s547_s0] sm:$0xff]  ;;  %vm166_vm1 = vcmask 31744   ;;  %vm194_vm2 = vcmask 130048  }
  0x15   : > { %p373_p1 = scmp.lt.s32.totalorder %s367_s20, %s549_s2 }
  0x16   : > { %s290_s24 = sshll.u32 %s158_s23, 2  ;;  %s368_s23 = scalar_lea.hbm %s367_s20, 8 }
  0x17   : > { %s163_s27 = scalar_lea.vmem %s548_s1, %s290_s24  ;;  %p369_p12 = scmp.ne.s32.totalorder %s367_s20, %s368_s23 }
  0x18   : > { %v165_v1 = vld [vmem:[%s163_s27] sm:$0xf]  ;;  %p374_p2 = scmp.lt.s32.totalorder %s372_s25, %s368_s23 }
  0x19   : > { %291 = vmatpush.msk.msra.mxu0 %vm170_vm0, %v165_v1  ;;  %p370_p13 = pnand %p369_p12, %p487_p4 }
  0x1a   : > { %292 = vmatmul.msk.f32.vlgmr.msra.gmra.mxu0 %vm166_vm1, %v164_v0  ;;  %p375_p3 = por %p374_p2, %p373_p1 }
  0x1b   : > { %p371_p0 = pneg %p370_p13 }
  0x1d   : > { %p376_p5 = pnand %p375_p3, %p371_p0 }
  0x97   : > { %v191_v2 = vpop.f32.mrf.mxu0 }
  0x98   : > { %195 = vst.msk [vmem:[%s156_s8] sm:$0xff] %vm194_vm2, %v191_v2 }
  0x99   : > { %379 = shalt.err (!%p376_p5)
}
  0x9a   : > { %297 = dma.vmem_to_hbm [thread:$0]  (%p487_p4), %s211_s15, 128, %s213_s16, %s197_s18  }
  0x9b PF: > { %p303_p6 = scmp.ge.s32.totalorder %s430_s14, 2  ;;  %s224_s28 = sand.u32 1, %s410_s9  }
  0x9c   : > { %s225_s29 = scalar_lea.sflag [#allocation3], %s224_s28 }
  0x9d   : > { %p300_p7 = pnand %p303_p6, %p494_p8 }
  0x9f   : > { %p301_p9 = pneg %p300_p7 }
  0xa1   : > { %405 = dma.done.wait (%p301_p9), %s225_s29, 128  }
  0xa2   : > { %407 = vsyncadd (%p301_p9), %s225_s29, 4294967168  ;;  %s15_s14 = sadd.s32 1, %s430_s14   ;;  %s552_s9 = smov %s414_s10 }
  0xa3   : > { %p12_p10 = scmp.ge.s32.totalorder %s15_s14, 4   ;;  %s553_s10 = smov %s418_s11 }
  0xa4   : > { %s554_s11 = smov %s500_s22  ;;  %s555_s12 = smov %s426_s13 }
  0xa5   : > { %s556_s13 = smov %s558_s17  ;;  %14 = sbr.rel (!%p12_p10) target bundleno = 4 (0x4), region = 63 }
  0xaa   :  { %231 = vsyncpa [#allocation3], 1 }
  0xab   :  { %233 = vsyncpa [#allocation3 + $0x1], 1 }

</bundles_post_ra>
